<compile_context>
chip_gen: v5e
topology: v5e:2x2
jax: 0.10.0
libtpu: 0.0.40
codegen_flags: <defaults>
</compile_context>

<pallas_src>
import functools

import jax
import jax.numpy as jnp
from jax.experimental import pallas as pl
from jax.experimental.pallas import tpu as pltpu

LOG_SIG_MIN = -5.0
LOG_SIG_MAX = 2.0
HIDDEN = 256


def _round_up(x, m):
    return ((x + m - 1) // m) * m


def _policy_kernel(x_ref, w1_ref, b1_ref, w2_ref, b2_ref, wh_ref, bh_ref,
                   cmin_ref, cmax_ref, out_ref):
    """One batch tile of the full MLP forward; weights stay VMEM-resident."""
    wdt = w1_ref.dtype  # MXU operand dtype (f32 or bf16); accumulation is f32.
    x = x_ref[...].astype(wdt)

    # Layer 0: Linear(num_inputs, 256) + ReLU.
    h1 = (jnp.dot(x, w1_ref[...], preferred_element_type=jnp.float32)
          + b1_ref[...])
    h1 = jnp.maximum(h1, 0.0)

    # Layer 1: Linear(256, 256) + ReLU.
    h2 = (jnp.dot(h1.astype(wdt), w2_ref[...], preferred_element_type=jnp.float32)
          + b2_ref[...])
    h2 = jnp.maximum(h2, 0.0)

    # Fused heads, padded to a lane-dense 128-wide slab: [mean | log_std | 0...].
    heads = (jnp.dot(h2.astype(wdt), wh_ref[...], preferred_element_type=jnp.float32)
             + bh_ref[...])

    # Per-column clamp: mean columns see (-inf, +inf), log_std columns see
    # (LOG_SIG_MIN, LOG_SIG_MAX). Padded columns are discarded by the wrapper.
    out_ref[...] = jnp.clip(heads, cmin_ref[...], cmax_ref[...]).astype(out_ref.dtype)


@functools.partial(jax.jit, static_argnames=("num_actions", "tb"))
def gaussian_policy_forward(state, lambdas, kparams, num_actions, tb=2048):
    """Pallas forward. `kparams` comes from prepare_params(); tb must be a
    multiple of 8 and caps the per-tile batch rows."""
    B = state.shape[0]
    x = jnp.concatenate([state, lambdas], axis=1)   # (B, num_inputs)
    num_inputs = x.shape[1]
    pad_w = kparams["wh"].shape[1]                  # 128-lane-padded head width

    # Batch tiling: one full-extent block for small B; otherwise >= 2 tiles
    # (TB multiple of 8, capped at tb) so v7x's two TensorCores both run.
    if B <= 128:
        TB, Bp = B, B
    else:
        TB = min(tb, _round_up(pl.cdiv(B, 2), 8))
        Bp = pl.cdiv(B, TB) * TB
    if Bp != B:
        x = jnp.pad(x, ((0, Bp - B), (0, 0)))
    grid = (Bp // TB,)

    resident = lambda a: pl.BlockSpec(a.shape, lambda i: (0, 0))

    # Advisory cost estimate so XLA overlaps surrounding ops with the kernel.
    flops = 2 * Bp * (num_inputs * HIDDEN + HIDDEN * HIDDEN + HIDDEN * pad_w)
    w_bytes = sum(int(a.size) * a.dtype.itemsize for a in kparams.values())
    io_bytes = 4 * Bp * (num_inputs + pad_w)
    cost = pl.CostEstimate(flops=flops, transcendentals=0,
                           bytes_accessed=w_bytes + io_bytes)

    out = pl.pallas_call(
        _policy_kernel,
        out_shape=jax.ShapeDtypeStruct((Bp, pad_w), jnp.float32),
        grid=grid,
        in_specs=[
            pl.BlockSpec((TB, num_inputs), lambda i: (i, 0)),   # input tile
            resident(kparams["w1"]),
            resident(kparams["b1"]),
            resident(kparams["w2"]),
            resident(kparams["b2"]),
            resident(kparams["wh"]),        # [Wm | Ws | 0-pad]
            resident(kparams["bh"]),        # [bm | bs | 0-pad]
            resident(kparams["clip_min"]),
            resident(kparams["clip_max"]),
        ],
        out_specs=pl.BlockSpec((TB, pad_w), lambda i: (i, 0)),
        compiler_params=pltpu.CompilerParams(
            dimension_semantics=("parallel",)),
        cost_estimate=cost,
    )(x, kparams["w1"], kparams["b1"], kparams["w2"], kparams["b2"],
      kparams["wh"], kparams["bh"], kparams["clip_min"], kparams["clip_max"])

    mean = out[:B, :num_actions]
    log_std = out[:B, num_actions:2 * num_actions]
    return mean, log_std


def prepare_params(params, num_actions, compute_dtype=jnp.float32):
    """Host-side repack: fuse the two heads, zero-pad them to a lane-dense
    128-wide slab, and build per-column clamp vectors. compute_dtype=bfloat16
    is supported on all generations (f32 accumulation in-kernel)."""
    cd = compute_dtype
    two_a = 2 * num_actions
    pad_w = max(128, _round_up(two_a, 128))

    wh = jnp.concatenate([params["wm"], params["ws"]], axis=1)
    bh = jnp.concatenate([params["bm"], params["bs"]], axis=1)
    wh = jnp.pad(wh, ((0, 0), (0, pad_w - two_a)))
    bh = jnp.pad(bh, ((0, 0), (0, pad_w - two_a)))

    col = jnp.arange(pad_w)[None, :]
    is_log_std = (col >= num_actions) & (col < two_a)
    clip_min = jnp.where(is_log_std, LOG_SIG_MIN, -jnp.inf).astype(jnp.float32)
    clip_max = jnp.where(is_log_std, LOG_SIG_MAX, jnp.inf).astype(jnp.float32)

    return {
        "w1": params["w1"].astype(cd),
        "b1": params["b1"].astype(jnp.float32),
        "w2": params["w2"].astype(cd),
        "b2": params["b2"].astype(jnp.float32),
        "wh": wh.astype(cd),
        "bh": bh.astype(jnp.float32),
        "clip_min": clip_min,
        "clip_max": clip_max,
    }


def xavier_uniform(key, fan_in, fan_out):
    limit = jnp.sqrt(6.0 / (fan_in + fan_out))
    return jax.random.uniform(key, (fan_in, fan_out), jnp.float32, -limit, limit)


def init_params(key, num_inputs, num_actions, hidden=HIDDEN):
    ks = jax.random.split(key, 4)
    return {
        "w1": xavier_uniform(ks[0], num_inputs, hidden),
        "b1": jnp.zeros((1, hidden), jnp.float32),
        "w2": xavier_uniform(ks[1], hidden, hidden),
        "b2": jnp.zeros((1, hidden), jnp.float32),
        "wm": xavier_uniform(ks[2], hidden, num_actions),
        "bm": jnp.zeros((1, num_actions), jnp.float32),
        "ws": xavier_uniform(ks[3], hidden, num_actions),
        "bs": jnp.zeros((1, num_actions), jnp.float32),
    }


if __name__ == "__main__":
    # Small shapes consistent with the module's forward:
    # state (B, state_dim), lambdas (B, lambda_dim), num_inputs = state_dim + lambda_dim
    B, state_dim, lambda_dim, num_actions = 2, 12, 4, 8
    num_inputs = state_dim + lambda_dim

    key = jax.random.PRNGKey(0)
    k_state, k_lam, k_params, k_big = jax.random.split(key, 4)

    state = jax.random.normal(k_state, (B, state_dim), jnp.float32)
    lambdas = jax.random.normal(k_lam, (B, lambda_dim), jnp.float32)
    params = init_params(k_params, num_inputs, num_actions)
    kparams = prepare_params(params, num_actions)  # f32 keeps the 1e-5 check tight

    mean, log_std = gaussian_policy_forward(state, lambdas, kparams, num_actions)
    jax.block_until_ready((mean, log_std))

    # Reference (same math as the PyTorch forward).
    def reference(st, lam):
        xin = jnp.concatenate([st, lam], axis=1)
        h1 = jnp.maximum(xin @ params["w1"] + params["b1"], 0.0)
        h2 = jnp.maximum(h1 @ params["w2"] + params["b2"], 0.0)
        m = h2 @ params["wm"] + params["bm"]
        ls = jnp.clip(h2 @ params["ws"] + params["bs"], LOG_SIG_MIN, LOG_SIG_MAX)
        return m, ls

    m_ref, ls_ref = reference(state, lambdas)
    assert mean.shape == (B, num_actions) and log_std.shape == (B, num_actions)
    assert jnp.allclose(mean, m_ref, atol=1e-5), "mean mismatch"
    assert jnp.allclose(log_std, ls_ref, atol=1e-5), "log_std mismatch"

    # Larger batch exercising the padded, multi-tile (>= 2 grid steps) path.
    B2 = 300
    ks2, kl2 = jax.random.split(k_big)
    state2 = jax.random.normal(ks2, (B2, state_dim), jnp.float32)
    lambdas2 = jax.random.normal(kl2, (B2, lambda_dim), jnp.float32)
    mean2, log_std2 = gaussian_policy_forward(state2, lambdas2, kparams, num_actions)
    jax.block_until_ready((mean2, log_std2))
    m2_ref, ls2_ref = reference(state2, lambdas2)
    assert jnp.allclose(mean2, m2_ref, atol=1e-4), "batched mean mismatch"
    assert jnp.allclose(log_std2, ls2_ref, atol=1e-4), "batched log_std mismatch"

    # TODO(synk): sample()/get_action() (Normal rsample + tanh squash + log-prob)
    # is stochastic policy-sampling outside forward(); a follow-up could fuse it
    # here with pltpu.prng_seed/prng_random_bits and EUP exp/tanh.
    print("KERNEL_OK")
</pallas_src>

<mosaic_0001>
module attributes {stable_mosaic.version = 11 : i64} {
  func.func @_policy_kernel(%arg0: i32, %arg1: memref<2x16xf32, #tpu.memory_space<vmem>>, %arg2: memref<16x256xf32, #tpu.memory_space<vmem>>, %arg3: memref<1x256xf32, #tpu.memory_space<vmem>>, %arg4: memref<256x256xf32, #tpu.memory_space<vmem>>, %arg5: memref<1x256xf32, #tpu.memory_space<vmem>>, %arg6: memref<256x128xf32, #tpu.memory_space<vmem>>, %arg7: memref<1x128xf32, #tpu.memory_space<vmem>>, %arg8: memref<1x128xf32, #tpu.memory_space<vmem>>, %arg9: memref<1x128xf32, #tpu.memory_space<vmem>>, %arg10: memref<2x128xf32, #tpu.memory_space<vmem>>) attributes {dimension_semantics = [#tpu.dimension_semantics<parallel>], iteration_bounds = array<i64: 1>, scalar_prefetch = 0 : i64, scratch_operands = 0 : i64, tpu.core_type = #tpu.core_type<tc>, window_params = [{transform_indices = @transform_0, window_bounds = array<i64: 2, 16>}, {pipeline_mode = #tpu.pipeline_mode<synchronous>, transform_indices = @transform_1, window_bounds = array<i64: 16, 256>}, {pipeline_mode = #tpu.pipeline_mode<synchronous>, transform_indices = @transform_2, window_bounds = array<i64: 1, 256>}, {pipeline_mode = #tpu.pipeline_mode<synchronous>, transform_indices = @transform_3, window_bounds = array<i64: 256, 256>}, {pipeline_mode = #tpu.pipeline_mode<synchronous>, transform_indices = @transform_4, window_bounds = array<i64: 1, 256>}, {pipeline_mode = #tpu.pipeline_mode<synchronous>, transform_indices = @transform_5, window_bounds = array<i64: 256, 128>}, {pipeline_mode = #tpu.pipeline_mode<synchronous>, transform_indices = @transform_6, window_bounds = array<i64: 1, 128>}, {pipeline_mode = #tpu.pipeline_mode<synchronous>, transform_indices = @transform_7, window_bounds = array<i64: 1, 128>}, {pipeline_mode = #tpu.pipeline_mode<synchronous>, transform_indices = @transform_8, window_bounds = array<i64: 1, 128>}, {transform_indices = @transform_9, window_bounds = array<i64: 2, 128>}]} {
    %c0 = arith.constant 0 : index
    %c0_0 = arith.constant 0 : index
    %0 = vector.load %arg1[%c0, %c0_0] : memref<2x16xf32, #tpu.memory_space<vmem>>, vector<2x16xf32>
    %c0_1 = arith.constant 0 : index
    %c0_2 = arith.constant 0 : index
    %1 = vector.load %arg2[%c0_1, %c0_2] : memref<16x256xf32, #tpu.memory_space<vmem>>, vector<16x256xf32>
    %cst = arith.constant dense<0.000000e+00> : vector<2x256xf32>
    %2 = tpu.matmul %0, %1, %cst {dimension_numbers = #tpu.dot_dimension_numbers<[1], [0], [0], [1], [0, 0, 1, 1], [], []>} : vector<2x16xf32>, vector<16x256xf32>, vector<2x256xf32> -> vector<2x256xf32>
    %c0_3 = arith.constant 0 : index
    %c0_4 = arith.constant 0 : index
    %3 = vector.load %arg3[%c0_3, %c0_4] : memref<1x256xf32, #tpu.memory_space<vmem>>, vector<1x256xf32>
    %4 = vector.broadcast %3 : vector<1x256xf32> to vector<2x256xf32>
    %5 = arith.addf %2, %4 : vector<2x256xf32>
    %cst_5 = arith.constant 0.000000e+00 : f32
    %6 = vector.broadcast %cst_5 : f32 to vector<2x256xf32>
    %7 = arith.maximumf %5, %6 : vector<2x256xf32>
    %c0_6 = arith.constant 0 : index
    %c0_7 = arith.constant 0 : index
    %8 = vector.load %arg4[%c0_6, %c0_7] : memref<256x256xf32, #tpu.memory_space<vmem>>, vector<256x256xf32>
    %cst_8 = arith.constant dense<0.000000e+00> : vector<2x256xf32>
    %9 = tpu.matmul %7, %8, %cst_8 {dimension_numbers = #tpu.dot_dimension_numbers<[1], [0], [0], [1], [0, 0, 1, 1], [], []>} : vector<2x256xf32>, vector<256x256xf32>, vector<2x256xf32> -> vector<2x256xf32>
    %c0_9 = arith.constant 0 : index
    %c0_10 = arith.constant 0 : index
    %10 = vector.load %arg5[%c0_9, %c0_10] : memref<1x256xf32, #tpu.memory_space<vmem>>, vector<1x256xf32>
    %11 = vector.broadcast %10 : vector<1x256xf32> to vector<2x256xf32>
    %12 = arith.addf %9, %11 : vector<2x256xf32>
    %cst_11 = arith.constant 0.000000e+00 : f32
    %13 = vector.broadcast %cst_11 : f32 to vector<2x256xf32>
    %14 = arith.maximumf %12, %13 : vector<2x256xf32>
    %c0_12 = arith.constant 0 : index
    %c0_13 = arith.constant 0 : index
    %15 = vector.load %arg6[%c0_12, %c0_13] : memref<256x128xf32, #tpu.memory_space<vmem>>, vector<256x128xf32>
    %cst_14 = arith.constant dense<0.000000e+00> : vector<2x128xf32>
    %16 = tpu.matmul %14, %15, %cst_14 {dimension_numbers = #tpu.dot_dimension_numbers<[1], [0], [0], [1], [0, 0, 1, 1], [], []>} : vector<2x256xf32>, vector<256x128xf32>, vector<2x128xf32> -> vector<2x128xf32>
    %c0_15 = arith.constant 0 : index
    %c0_16 = arith.constant 0 : index
    %17 = vector.load %arg7[%c0_15, %c0_16] : memref<1x128xf32, #tpu.memory_space<vmem>>, vector<1x128xf32>
    %18 = vector.broadcast %17 : vector<1x128xf32> to vector<2x128xf32>
    %19 = arith.addf %16, %18 : vector<2x128xf32>
    %c0_17 = arith.constant 0 : index
    %c0_18 = arith.constant 0 : index
    %20 = vector.load %arg8[%c0_17, %c0_18] : memref<1x128xf32, #tpu.memory_space<vmem>>, vector<1x128xf32>
    %c0_19 = arith.constant 0 : index
    %c0_20 = arith.constant 0 : index
    %21 = vector.load %arg9[%c0_19, %c0_20] : memref<1x128xf32, #tpu.memory_space<vmem>>, vector<1x128xf32>
    %22 = vector.broadcast %20 : vector<1x128xf32> to vector<2x128xf32>
    %23 = arith.maximumf %22, %19 : vector<2x128xf32>
    %24 = vector.broadcast %21 : vector<1x128xf32> to vector<2x128xf32>
    %25 = arith.minimumf %24, %23 : vector<2x128xf32>
    %c0_21 = arith.constant 0 : index
    %c0_22 = arith.constant 0 : index
    %26 = vector.load %arg10[%c0_21, %c0_22] : memref<2x128xf32, #tpu.memory_space<vmem>>, vector<2x128xf32>
    tpu.vector_store %arg10[%c0_21, %c0_22], %25 {strides = array<i32>} : memref<2x128xf32, #tpu.memory_space<vmem>>, vector<2x128xf32>,
    return
  }
  func.func @transform_0(%arg0: i32) -> (i32, i32) {
    %c0_i32 = arith.constant 0 : i32
    %c0_i32_0 = arith.constant 0 : i32
    return %arg0, %c0_i32 : i32, i32
  }
  func.func @transform_1(%arg0: i32) -> (i32, i32) {
    %c0_i32 = arith.constant 0 : i32
    %c0_i32_0 = arith.constant 0 : i32
    %c0_i32_1 = arith.constant 0 : i32
    return %c0_i32, %c0_i32_0 : i32, i32
  }
  func.func @transform_2(%arg0: i32) -> (i32, i32) {
    %c0_i32 = arith.constant 0 : i32
    %c0_i32_0 = arith.constant 0 : i32
    %c0_i32_1 = arith.constant 0 : i32
    return %c0_i32, %c0_i32_0 : i32, i32
  }
  func.func @transform_3(%arg0: i32) -> (i32, i32) {
    %c0_i32 = arith.constant 0 : i32
    %c0_i32_0 = arith.constant 0 : i32
    %c0_i32_1 = arith.constant 0 : i32
    return %c0_i32, %c0_i32_0 : i32, i32
  }
  func.func @transform_4(%arg0: i32) -> (i32, i32) {
    %c0_i32 = arith.constant 0 : i32
    %c0_i32_0 = arith.constant 0 : i32
    %c0_i32_1 = arith.constant 0 : i32
    return %c0_i32, %c0_i32_0 : i32, i32
  }
  func.func @transform_5(%arg0: i32) -> (i32, i32) {
    %c0_i32 = arith.constant 0 : i32
    %c0_i32_0 = arith.constant 0 : i32
    %c0_i32_1 = arith.constant 0 : i32
    return %c0_i32, %c0_i32_0 : i32, i32
  }
  func.func @transform_6(%arg0: i32) -> (i32, i32) {
    %c0_i32 = arith.constant 0 : i32
    %c0_i32_0 = arith.constant 0 : i32
    %c0_i32_1 = arith.constant 0 : i32
    return %c0_i32, %c0_i32_0 : i32, i32
  }
  func.func @transform_7(%arg0: i32) -> (i32, i32) {
    %c0_i32 = arith.constant 0 : i32
    %c0_i32_0 = arith.constant 0 : i32
    %c0_i32_1 = arith.constant 0 : i32
    return %c0_i32, %c0_i32_0 : i32, i32
  }
  func.func @transform_8(%arg0: i32) -> (i32, i32) {
    %c0_i32 = arith.constant 0 : i32
    %c0_i32_0 = arith.constant 0 : i32
    %c0_i32_1 = arith.constant 0 : i32
    return %c0_i32, %c0_i32_0 : i32, i32
  }
  func.func @transform_9(%arg0: i32) -> (i32, i32) {
    %c0_i32 = arith.constant 0 : i32
    %c0_i32_0 = arith.constant 0 : i32
    return %arg0, %c0_i32 : i32, i32
  }
}

</mosaic_0001>

<bundles_post_ra>
// kernel: gaussian_policy_forward.1
= control target key start
LH: loop header
LB: loop body
LE: loop exit
PB: predicated region body
PF: predicated region fallthrough
CT: control target
= control target key end

     0   :  { %14 = vsyncpa [#allocation3], 0  ;;  %s556_s0 = inlined_call_operand.vmem [shape: f32[2,16], index: 0, kind: input, shape index: {}]   ;;  %s557_s1 = inlined_call_operand.hbm [shape: f32[16,256], index: 1, kind: input, shape index: {}]   ;;  %s558_s2 = inlined_call_operand.vmem [shape: f32[1,256], index: 2, kind: input, shape index: {}]   ;;  %s559_s3 = inlined_call_operand.hbm [shape: f32[256,256], index: 3, kind: input, shape index: {}]   ;;  %s560_s4 = inlined_call_operand.vmem [shape: f32[1,256], index: 4, kind: input, shape index: {}]   ;;  %s561_s5 = inlined_call_operand.hbm [shape: f32[256,128], index: 5, kind: input, shape index: {}]   ;;  %s562_s6 = inlined_call_operand.vmem [shape: f32[1,128], index: 6, kind: input, shape index: {}]   ;;  %s563_s7 = inlined_call_operand.vmem [shape: f32[1,128], index: 7, kind: input, shape index: {}]   ;;  %s564_s8 = inlined_call_operand.vmem [shape: f32[1,128], index: 8, kind: input, shape index: {}]   ;;  %s565_s9 = inlined_call_operand.vmem [shape: f32[2,128], index: 9, kind: output, shape index: {}]  }
   0x1   :  { %15 = vsyncpa [#allocation5], 0  ;;  %s37_s11 = sshll.u32 %s559_s3, 4  ;;  %s469_s12 = smov [#allocation4]   ;;  %s38_s11 = int_to_ptr.hbm [resolvable:$true] %s37_s11 }
   0x2   :  { %s39_s13 = sshll.u32 %s469_s12, 4  ;;  %s22_s16 = sshll.u32 %s557_s1, 4  ;;  %s40_s13 = int_to_ptr.vmem [resolvable:$true] %s39_s13  ;;  %s23_s16 = int_to_ptr.hbm [resolvable:$true] %s22_s16 }
   0x3   :  { %s470_s17 = smov 256   ;;  %s471_s18 = smov 16  }
   0x4   :  { %45 = dma.hbm_to_vmem [thread:$0]  %s38_s11, 8192, %s40_s13, [#allocation5], %s470_s17, %s470_s17, %s471_s18  }
   0x5   :  { %s472_s19 = smov [#allocation2]   ;;  %s52_s23 = sshll.u32 %s561_s5, 4  ;;  %s53_s23 = int_to_ptr.hbm [resolvable:$true] %s52_s23 }
   0x6   :  { %s24_s20 = sshll.u32 %s472_s19, 4  ;;  %s473_s3 = smov [#allocation6]   ;;  %s25_s20 = int_to_ptr.vmem [resolvable:$true] %s24_s20 }
   0x7   :  { %30 = dma.hbm_to_vmem [thread:$0]  %s23_s16, 512, %s25_s20, [#allocation3], %s470_s17, %s470_s17, %s471_s18  }
   0x8   :  { %s54_s24 = sshll.u32 %s473_s3, 4  ;;  %s474_s25 = smov 128   ;;  %s55_s24 = int_to_ptr.vmem [resolvable:$true] %s54_s24 }
   0x9   :  { %s475_s26 = smov 8  }
   0xa   :  { %60 = dma.hbm_to_vmem [thread:$0]  %s53_s23, 4096, %s55_s24, [#allocation5], %s474_s25, %s474_s25, %s475_s26  }
   0xb   :  { %465 = dma.done.wait [#allocation3], 512  }
   0xc   :  { %466 = vsyncadd [#allocation3], 4294966784 }
   0xd   :  { %467 = dma.done.wait [#allocation5], 12288  }
   0xe   :  { %468 = vsyncadd [#allocation5], 4294955008  ;;  %v82_v0 = vld [vmem:[#allocation2 + $0x10] sm:$0xff]  ;;  %v80_v1 = vld [vmem:[#allocation2] sm:$0xff]  ;;  %vm90_vm0 = vcmask 130048  }
   0xf   :  { %v83_v2 = vld [vmem:[#allocation2 + $0x18] sm:$0xff]  ;;  %108 = vmatpush.msra.mxu0 %v82_v0  ;;  %v79_v3 = vld [vmem:[%s556_s0] sm:$0x3]  ;;  %v81_v4 = vld [vmem:[#allocation2 + $0x8] sm:$0xff] }
  0x10   :  { %128 = vmatpush.msra.mxu1 %v83_v2  ;;  %v166_v5 = vld [vmem:[#allocation4 + $0xf0] sm:$0xff]  ;;  %v167_v6 = vld [vmem:[#allocation4 + $0xf8] sm:$0xff]  ;;  %v164_v7 = vld [vmem:[#allocation4 + $0xe0] sm:$0xff] }
  0x11   :  { %206 = vmatpush.msra.mxu2 %v166_v5  ;;  %109 = vmatpush.msra.mxu0 %v80_v1  ;;  %v198_v8 = vld [vmem:[#allocation4 + $0x1f0] sm:$0xff]  ;;  %v199_v9 = vld [vmem:[#allocation4 + $0x1f8] sm:$0xff]  ;;  %v165_v10 = vld [vmem:[#allocation4 + $0xe8] sm:$0xff] }
  0x12   :  { %129 = vmatpush.msra.mxu1 %v81_v4  ;;  %381 = vmatmul.msk.f32.vlgmr.msra.gmra.mxu0 %vm90_vm0, %v79_v3  ;;  %v162_v11 = vld [vmem:[#allocation4 + $0xd0] sm:$0xff]  ;;  %v196_v12 = vld [vmem:[#allocation4 + $0x1e0] sm:$0xff]  ;;  %v197_v13 = vld [vmem:[#allocation4 + $0x1e8] sm:$0xff] }
  0x13   :  { %382 = vmatmul.msk.f32.vlgmr.msra.gmra.mxu1 %vm90_vm0, %v79_v3  ;;  %246 = vmatpush.msrb.mxu0 %v167_v6  ;;  %v163_v14 = vld [vmem:[#allocation4 + $0xd8] sm:$0xff]  ;;  %v160_v15 = vld [vmem:[#allocation4 + $0xc0] sm:$0xff]  ;;  %v194_v16 = vld [vmem:[#allocation4 + $0x1d0] sm:$0xff] }
  0x14   :  { %207 = vmatpush.msra.mxu2 %v164_v7  ;;  %226 = vmatpush.msra.mxu3 %v198_v8  ;;  %v195_v17 = vld [vmem:[#allocation4 + $0x1d8] sm:$0xff]  ;;  %v161_v18 = vld [vmem:[#allocation4 + $0xc8] sm:$0xff]  ;;  %v158_v19 = vld [vmem:[#allocation4 + $0xb0] sm:$0xff] }
  0x15   :  { %266 = vmatpush.msrb.mxu1 %v199_v9  ;;  %247 = vmatpush.msrb.mxu0 %v165_v10  ;;  %v192_v20 = vld [vmem:[#allocation4 + $0x1c0] sm:$0xff]  ;;  %v193_v21 = vld [vmem:[#allocation4 + $0x1c8] sm:$0xff]  ;;  %v159_v22 = vld [vmem:[#allocation4 + $0xb8] sm:$0xff] }
  0x16   :  { %208 = vmatpush.msra.mxu2 %v162_v11  ;;  %227 = vmatpush.msra.mxu3 %v196_v12  ;;  %v156_v23 = vld [vmem:[#allocation4 + $0xa0] sm:$0xff]  ;;  %v190_v24 = vld [vmem:[#allocation4 + $0x1b0] sm:$0xff]  ;;  %v191_v25 = vld [vmem:[#allocation4 + $0x1b8] sm:$0xff] }
  0x17   :  { %267 = vmatpush.msrb.mxu1 %v197_v13  ;;  %248 = vmatpush.msrb.mxu0 %v163_v14  ;;  %v157_v26 = vld [vmem:[#allocation4 + $0xa8] sm:$0xff]  ;;  %v154_v27 = vld [vmem:[#allocation4 + $0x90] sm:$0xff]  ;;  %v188_v28 = vld [vmem:[#allocation4 + $0x1a0] sm:$0xff] }
  0x18   :  { %209 = vmatpush.msra.mxu2 %v160_v15  ;;  %228 = vmatpush.msra.mxu3 %v194_v16  ;;  %v189_v29 = vld [vmem:[#allocation4 + $0x1a8] sm:$0xff]  ;;  %v155_v30 = vld [vmem:[#allocation4 + $0x98] sm:$0xff]  ;;  %v152_v31 = vld [vmem:[#allocation4 + $0x80] sm:$0xff] }
  0x19   :  { %268 = vmatpush.msrb.mxu1 %v195_v17  ;;  %249 = vmatpush.msrb.mxu0 %v161_v18  ;;  %v186_v32 = vld [vmem:[#allocation4 + $0x190] sm:$0xff]  ;;  %v187_v33 = vld [vmem:[#allocation4 + $0x198] sm:$0xff]  ;;  %v153_v34 = vld [vmem:[#allocation4 + $0x88] sm:$0xff] }
  0x1a   :  { %210 = vmatpush.msra.mxu2 %v158_v19  ;;  %229 = vmatpush.msra.mxu3 %v192_v20  ;;  %v150_v35 = vld [vmem:[#allocation4 + $0x70] sm:$0xff]  ;;  %v184_v36 = vld [vmem:[#allocation4 + $0x180] sm:$0xff]  ;;  %v151_v37 = vld [vmem:[#allocation4 + $0x78] sm:$0xff] }
  0x1b   :  { %269 = vmatpush.msrb.mxu1 %v193_v21  ;;  %250 = vmatpush.msrb.mxu0 %v159_v22  ;;  %v185_v38 = vld [vmem:[#allocation4 + $0x188] sm:$0xff]  ;;  %v148_v39 = vld [vmem:[#allocation4 + $0x60] sm:$0xff]  ;;  %v182_v40 = vld [vmem:[#allocation4 + $0x170] sm:$0xff] }
  0x1c   :  { %211 = vmatpush.msra.mxu2 %v156_v23  ;;  %230 = vmatpush.msra.mxu3 %v190_v24  ;;  %v183_v41 = vld [vmem:[#allocation4 + $0x178] sm:$0xff]  ;;  %v149_v42 = vld [vmem:[#allocation4 + $0x68] sm:$0xff]  ;;  %v146_v43 = vld [vmem:[#allocation4 + $0x50] sm:$0xff] }
  0x1d   :  { %270 = vmatpush.msrb.mxu1 %v191_v25  ;;  %251 = vmatpush.msrb.mxu0 %v157_v26  ;;  %v180_v44 = vld [vmem:[#allocation4 + $0x160] sm:$0xff]  ;;  %v181_v45 = vld [vmem:[#allocation4 + $0x168] sm:$0xff]  ;;  %v147_v46 = vld [vmem:[#allocation4 + $0x58] sm:$0xff] }
  0x1e   :  { %212 = vmatpush.msra.mxu2 %v154_v27  ;;  %231 = vmatpush.msra.mxu3 %v188_v28  ;;  %v144_v47 = vld [vmem:[#allocation4 + $0x40] sm:$0xff]  ;;  %v178_v48 = vld [vmem:[#allocation4 + $0x150] sm:$0xff]  ;;  %v179_v49 = vld [vmem:[#allocation4 + $0x158] sm:$0xff] }
  0x1f   :  { %271 = vmatpush.msrb.mxu1 %v189_v29  ;;  %252 = vmatpush.msrb.mxu0 %v155_v30  ;;  %v145_v50 = vld [vmem:[#allocation4 + $0x48] sm:$0xff]  ;;  %v142_v51 = vld [vmem:[#allocation4 + $0x30] sm:$0xff]  ;;  %v176_v52 = vld [vmem:[#allocation4 + $0x140] sm:$0xff] }
  0x20   :  { %213 = vmatpush.msra.mxu2 %v152_v31  ;;  %232 = vmatpush.msra.mxu3 %v186_v32  ;;  %v177_v53 = vld [vmem:[#allocation4 + $0x148] sm:$0xff]  ;;  %v143_v54 = vld [vmem:[#allocation4 + $0x38] sm:$0xff]  ;;  %v140_v55 = vld [vmem:[#allocation4 + $0x20] sm:$0xff] }
  0x21   :  { %272 = vmatpush.msrb.mxu1 %v187_v33  ;;  %253 = vmatpush.msrb.mxu0 %v153_v34  ;;  %v174_v56 = vld [vmem:[#allocation4 + $0x130] sm:$0xff]  ;;  %v141_v57 = vld [vmem:[#allocation4 + $0x28] sm:$0xff]  ;;  %v175_v58 = vld [vmem:[#allocation4 + $0x138] sm:$0xff] }
  0x22   :  { %214 = vmatpush.msra.mxu2 %v150_v35  ;;  %233 = vmatpush.msra.mxu3 %v184_v36  ;;  %v138_v59 = vld [vmem:[#allocation4 + $0x10] sm:$0xff]  ;;  %v172_v60 = vld [vmem:[#allocation4 + $0x120] sm:$0xff]  ;;  %v139_v61 = vld [vmem:[#allocation4 + $0x18] sm:$0xff] }
  0x23   :  { %273 = vmatpush.msrb.mxu1 %v185_v38  ;;  %254 = vmatpush.msrb.mxu0 %v151_v37  ;;  %v173_v62 = vld [vmem:[#allocation4 + $0x128] sm:$0xff]  ;;  %v136_v63 = vld [vmem:[#allocation4] sm:$0xff]  ;;  %v170_v0 = vld [vmem:[#allocation4 + $0x110] sm:$0xff] }
  0x24   :  { %215 = vmatpush.msra.mxu2 %v148_v39  ;;  %234 = vmatpush.msra.mxu3 %v182_v40  ;;  %v137_v1 = vld [vmem:[#allocation4 + $0x8] sm:$0xff]  ;;  %v171_v2 = vld [vmem:[#allocation4 + $0x118] sm:$0xff]  ;;  %v168_v3 = vld [vmem:[#allocation4 + $0x100] sm:$0xff] }
  0x25   :  { %274 = vmatpush.msrb.mxu1 %v183_v41  ;;  %255 = vmatpush.msrb.mxu0 %v149_v42  ;;  %v169_v4 = vld [vmem:[#allocation4 + $0x108] sm:$0xff]  ;;  %v319_v5 = vld [vmem:[#allocation6 + $0xf8] sm:$0xff]  ;;  %v318_v6 = vld [vmem:[#allocation6 + $0xf0] sm:$0xff] }
  0x26   :  { %216 = vmatpush.msra.mxu2 %v146_v43  ;;  %235 = vmatpush.msra.mxu3 %v180_v44  ;;  %v303_v7 = vld [vmem:[#allocation6 + $0x78] sm:$0xff]  ;;  %v302_v8 = vld [vmem:[#allocation6 + $0x70] sm:$0xff]  ;;  %v317_v9 = vld [vmem:[#allocation6 + $0xe8] sm:$0xff] }
  0x27   :  { %275 = vmatpush.msrb.mxu1 %v181_v45  ;;  %256 = vmatpush.msrb.mxu0 %v147_v46  ;;  %v301_v10 = vld [vmem:[#allocation6 + $0x68] sm:$0xff]  ;;  %v316_v11 = vld [vmem:[#allocation6 + $0xe0] sm:$0xff]  ;;  %v315_v13 = vld [vmem:[#allocation6 + $0xd8] sm:$0xff] }
  0x28   :  { %217 = vmatpush.msra.mxu2 %v144_v47  ;;  %236 = vmatpush.msra.mxu3 %v178_v48  ;;  %v300_v12 = vld [vmem:[#allocation6 + $0x60] sm:$0xff]  ;;  %v299_v14 = vld [vmem:[#allocation6 + $0x58] sm:$0xff]  ;;  %v314_v15 = vld [vmem:[#allocation6 + $0xd0] sm:$0xff] }
  0x29   :  { %276 = vmatpush.msrb.mxu1 %v179_v49  ;;  %257 = vmatpush.msrb.mxu0 %v145_v50  ;;  %v298_v16 = vld [vmem:[#allocation6 + $0x50] sm:$0xff]  ;;  %v313_v17 = vld [vmem:[#allocation6 + $0xc8] sm:$0xff]  ;;  %v312_v19 = vld [vmem:[#allocation6 + $0xc0] sm:$0xff] }
  0x2a   :  { %218 = vmatpush.msra.mxu2 %v142_v51  ;;  %237 = vmatpush.msra.mxu3 %v176_v52  ;;  %v297_v18 = vld [vmem:[#allocation6 + $0x48] sm:$0xff]  ;;  %v296_v20 = vld [vmem:[#allocation6 + $0x40] sm:$0xff]  ;;  %v311_v21 = vld [vmem:[#allocation6 + $0xb8] sm:$0xff] }
  0x2b   :  { %277 = vmatpush.msrb.mxu1 %v177_v53  ;;  %258 = vmatpush.msrb.mxu0 %v143_v54  ;;  %v295_v22 = vld [vmem:[#allocation6 + $0x38] sm:$0xff]  ;;  %v310_v23 = vld [vmem:[#allocation6 + $0xb0] sm:$0xff]  ;;  %v309_v24 = vld [vmem:[#allocation6 + $0xa8] sm:$0xff] }
  0x2c   :  { %219 = vmatpush.msra.mxu2 %v140_v55  ;;  %238 = vmatpush.msra.mxu3 %v174_v56  ;;  %v84_v25 = vld [vmem:[%s558_s2] sm:$0x3]  ;;  %v294_v35 = vld [vmem:[#allocation6 + $0x30] sm:$0xff]  ;;  %v307_v36 = vld [vmem:[#allocation6 + $0x98] sm:$0xff] }
  0x2d   :  { %259 = vmatpush.msrb.mxu0 %v141_v57  ;;  %278 = vmatpush.msrb.mxu1 %v175_v58  ;;  %v308_v26 = vld [vmem:[#allocation6 + $0xa0] sm:$0xff]  ;;  %v86_v27 = vperm.slane %v84_v25, 0  ;;  %v87_v28 = vperm.slane %v84_v25, 1  ;;  %v293_v37 = vld [vmem:[#allocation6 + $0x28] sm:$0xff]  ;;  %v306_v38 = vld [vmem:[#allocation6 + $0x90] sm:$0xff] }
  0x2e   :  { %220 = vmatpush.msra.mxu2 %v138_v59  ;;  %239 = vmatpush.msra.mxu3 %v172_v60  ;;  %v292_v39 = vld [vmem:[#allocation6 + $0x20] sm:$0xff]  ;;  %v305_v40 = vld [vmem:[#allocation6 + $0x88] sm:$0xff]  ;;  %v291_v41 = vld [vmem:[#allocation6 + $0x18] sm:$0xff] }
  0x2f   :  { %260 = vmatpush.msrb.mxu0 %v139_v61  ;;  %279 = vmatpush.msrb.mxu1 %v173_v62  ;;  %v304_v42 = vld [vmem:[#allocation6 + $0x80] sm:$0xff]  ;;  %v290_v43 = vld [vmem:[#allocation6 + $0x10] sm:$0xff]  ;;  %v289_v44 = vld [vmem:[#allocation6 + $0x8] sm:$0xff] }
  0x30   :  { %221 = vmatpush.msra.mxu2 %v136_v63  ;;  %240 = vmatpush.msra.mxu3 %v170_v0  ;;  %v288_v45 = vld [vmem:[#allocation6] sm:$0xff] }
  0x31   :  { %261 = vmatpush.msrb.mxu0 %v137_v1  ;;  %280 = vmatpush.msrb.mxu1 %v171_v2  ;;  %v200_v46 = vld [vmem:[%s560_s4] sm:$0x3] }
  0x32   :  { %241 = vmatpush.msra.mxu3 %v168_v3  ;;  %324 = vmatpush.msrb.mxu2 %v303_v7  ;;  %v203_v47 = vperm.slane %v200_v46, 1  ;;  %v202_v52 = vperm.slane %v200_v46, 0  ;;  %v390_v59 = vld [vmem:[%s562_s6] ss:$0 sm:$0xff] }
  0x33   :  { %281 = vmatpush.msrb.mxu1 %v169_v4  ;;  %v391_v62 = vld [vmem:[%s563_s7] ss:$0 sm:$0xff] }
  0x34   :  { %344 = vmatpush.msrb.mxu3 %v319_v5  ;;  %325 = vmatpush.msrb.mxu2 %v302_v8  ;;  %v392_v1 = vld [vmem:[%s564_s8] ss:$0 sm:$0xff] }
  0x36   :  { %345 = vmatpush.msrb.mxu3 %v318_v6  ;;  %326 = vmatpush.msrb.mxu2 %v301_v10 }
  0x38   :  { %346 = vmatpush.msrb.mxu3 %v317_v9  ;;  %327 = vmatpush.msrb.mxu2 %v300_v12 }
  0x3a   :  { %347 = vmatpush.msrb.mxu3 %v316_v11  ;;  %328 = vmatpush.msrb.mxu2 %v299_v14 }
  0x3c   :  { %348 = vmatpush.msrb.mxu3 %v315_v13  ;;  %329 = vmatpush.msrb.mxu2 %v298_v16 }
  0x3e   :  { %349 = vmatpush.msrb.mxu3 %v314_v15  ;;  %330 = vmatpush.msrb.mxu2 %v297_v18 }
  0x40   :  { %350 = vmatpush.msrb.mxu3 %v313_v17  ;;  %331 = vmatpush.msrb.mxu2 %v296_v20 }
  0x42   :  { %351 = vmatpush.msrb.mxu3 %v312_v19  ;;  %332 = vmatpush.msrb.mxu2 %v295_v22 }
  0x44   :  { %352 = vmatpush.msrb.mxu3 %v311_v21  ;;  %333 = vmatpush.msrb.mxu2 %v294_v35 }
  0x46   :  { %353 = vmatpush.msrb.mxu3 %v310_v23  ;;  %334 = vmatpush.msrb.mxu2 %v293_v37 }
  0x48   :  { %354 = vmatpush.msrb.mxu3 %v309_v24  ;;  %335 = vmatpush.msrb.mxu2 %v292_v39 }
  0x4a   :  { %355 = vmatpush.msrb.mxu3 %v308_v26  ;;  %336 = vmatpush.msrb.mxu2 %v291_v41 }
  0x4c   :  { %356 = vmatpush.msrb.mxu3 %v307_v36  ;;  %337 = vmatpush.msrb.mxu2 %v290_v43 }
  0x4e   :  { %357 = vmatpush.msrb.mxu3 %v306_v38  ;;  %338 = vmatpush.msrb.mxu2 %v289_v44 }
  0x50   :  { %358 = vmatpush.msrb.mxu3 %v305_v40  ;;  %339 = vmatpush.msrb.mxu2 %v288_v45 }
  0x52   :  { %359 = vmatpush.msrb.mxu3 %v304_v42 }
  0x8f   :  { %v111_v29 = vpop.f32.mrf.mxu0 }
  0x90   :  { %v131_v30 = vpop.f32.mrf.mxu1  ;;  %v112_v31 = vadd.f32 %v111_v29, %v86_v27 }
  0x91   :  { %v132_v32 = vadd.f32 %v131_v30, %v87_v28 }
  0x92   :  { %v134_v33 = vmax.f32 %v112_v31, 0.0 }
  0x93   :  { %v135_v34 = vmax.f32 %v132_v32, 0.0 }
  0x94   :  { %222 = vmatmul.f32.vlgmr.msra.gmra.mxu2 %v134_v33  ;;  %262 = vmatmul.f32.vlgmr.msrb.gmra.mxu0 %v134_v33 }
  0x95   :  { %242 = vmatmul.f32.vlgmr.msra.gmra.mxu3 %v135_v34  ;;  %282 = vmatmul.f32.vlgmr.msrb.gmra.mxu1 %v135_v34 }
 0x111   :  { %v263_v48 = vpop.f32.mrf.mxu0 }
 0x112   :  { %v264_v49 = vadd.f32 %v263_v48, %v203_v47  ;;  %v283_v50 = vpop.f32.mrf.mxu1 }
 0x114   :  { %v284_v51 = vadd.f32 %v283_v50, %v264_v49 }
 0x116   :  { %v287_v53 = vmax.f32 %v284_v51, 0.0 }
 0x117   :  { %v223_v54 = vpop.f32.mrf.mxu2 }
 0x118   :  { %v224_v55 = vadd.f32 %v223_v54, %v202_v52  ;;  %360 = vmatmul.f32.vlgmr.msrb.gmra.mxu3 %v287_v53  ;;  %v243_v56 = vpop.f32.mrf.mxu3 }
 0x11a   :  { %v244_v57 = vadd.f32 %v243_v56, %v224_v55 }
 0x11c   :  { %v286_v58 = vmax.f32 %v244_v57, 0.0 }
 0x11e   :  { %340 = vmatmul.f32.vlgmr.msrb.gmra.mxu2 %v286_v58 }
 0x19b   :  { %v361_v63 = vpop.f32.mrf.mxu3 }
 0x1a1   :  { %v341_v60 = vpop.f32.mrf.mxu2 }
 0x1a2   :  { %v342_v61 = vadd.f32 %v390_v59, %v341_v60 }
 0x1a4   :  { %v362_v0 = vadd.f32 %v361_v63, %v342_v61 }
 0x1a6   :  { %v369_v2 = vmax.f32 %v391_v62, %v362_v0 }
 0x1a8   :  { %v373_v3 = vmin.f32 %v392_v1, %v369_v2 }
 0x1aa   :  { %374 = vst [vmem:[%s565_s9] sm:$0x3] %v373_v3 }
 0x1ab   :  { %379 = vsyncpa [#allocation3], 1 }
 0x1ac   :  { %380 = vsyncpa [#allocation5], 1 }

</bundles_post_ra>
